<compile_context>
chip_gen: v7x
topology: tpu7x:2x2x1
jax: 0.10.0
libtpu: 0.0.40
codegen_flags: <defaults>
</compile_context>

<pallas_src>
import numpy as np

import jax
import jax.numpy as jnp
from jax.experimental import pallas as pl
from jax.experimental.pallas import tpu as pltpu


def _round_up(n, m):
    return ((n + m - 1) // m) * m


def _mlp_head_kernel(x_ref, wbt_ref, bbt_ref, wot_ref, bot_ref,
                     tri_ref, msk_ref, out_ref):
    # model_base (stand-in linear): [ff, in] @ [in, cols] -> [ff, cols], ReLU.
    h = jnp.dot(wbt_ref[...], x_ref[...], preferred_element_type=jnp.float32)
    h = jnp.maximum(h + bbt_ref[...], 0.0)
    # output layer: [out, ff] @ [ff, cols] -> [out, cols]
    raw = jnp.dot(wot_ref[...], h, preferred_element_type=jnp.float32) + bot_ref[...]

    # Numerically-safe softplus (== log(1 + exp(x)) for moderate x, == x for x >> 0).
    sp = jnp.where(raw > 20.0, raw,
                   jnp.log(1.0 + jnp.exp(jnp.minimum(raw, 20.0))))
    # Row 0 keeps raw (h_0); rows >= 1 become softplus gaps.
    z = jnp.where(msk_ref[...] > 0.0, sp, raw)
    # out[j, :] = z[0, :] + sum_{1 <= k <= j} z[k, :]  ==  TRIL @ z  (fused h0 + cumsum)
    out_ref[...] = jnp.dot(tri_ref[...], z,
                           preferred_element_type=jnp.float32).astype(out_ref.dtype)


def _mlp_kernel(x_ref, wbt_ref, bbt_ref, wot_ref, bot_ref, out_ref):
    # output_dim == 1 path: no quantile head.
    h = jnp.dot(wbt_ref[...], x_ref[...], preferred_element_type=jnp.float32)
    h = jnp.maximum(h + bbt_ref[...], 0.0)
    raw = jnp.dot(wot_ref[...], h, preferred_element_type=jnp.float32) + bot_ref[...]
    out_ref[...] = raw.astype(out_ref.dtype)


def deep_quant_reg(x, params, *, num_diseases, output_dim, lane_tile=1024):
    """Pallas implementation of DeepQuantReg.forward.

    x: [B, num_diseases, input_dim] float32
    params: (w_base [in, ff], b_base [1, ff], w_out [ff, output_dim], b_out [1, output_dim])
    returns: [B, num_diseases, output_dim] float32
    """
    wb, bb, wo, bo = params
    B, nd, input_dim = x.shape
    assert nd == num_diseases
    dim_ff = wb.shape[1]
    rows = B * nd

    # Lane tile: multiple of 128, capped at lane_tile, no larger than needed.
    # (per-tile live intermediates stay in the 100s-of-KiB range -> well under the
    #  scoped VMEM default on all of v5e/v6e/v7x; larger tiles amortize the
    #  ~0.35us per-grid-step overhead.)
    rows128 = _round_up(rows, 128)
    cap = max(128, _round_up(lane_tile, 128))
    tile = min(cap, rows128)
    rows_padded = _round_up(rows, tile)

    # Transposed / padded inputs (wrapper-side XLA ops, one each; all tiny).
    x2 = x.reshape(rows, input_dim)
    if rows_padded != rows:
        x2 = jnp.pad(x2, ((0, rows_padded - rows), (0, 0)))
    xt = x2.T                                  # [input_dim, rows_padded]
    wbt = wb.T                                 # [ff, in]
    bbt = bb.reshape(dim_ff, 1)                # [ff, 1]
    wot = wo.T                                 # [out, ff]
    bot = bo.reshape(output_dim, 1)            # [out, 1]

    in_specs = [
        pl.BlockSpec((input_dim, tile), lambda i: (0, i)),          # x^T tile (lane-dense)
        pl.BlockSpec((dim_ff, input_dim), lambda i: (0, 0)),        # Wb^T (resident)
        pl.BlockSpec((dim_ff, 1), lambda i: (0, 0)),                # bb^T (resident)
        pl.BlockSpec((output_dim, dim_ff), lambda i: (0, 0)),       # Wo^T (resident)
        pl.BlockSpec((output_dim, 1), lambda i: (0, 0)),            # bo^T (resident)
    ]
    args = [xt, wbt, bbt, wot, bot]

    if output_dim > 1:
        # Compile-time constants for the quantile head (resident inputs).
        tri = jnp.asarray(np.tril(np.ones((output_dim, output_dim), np.float32)))
        msk_np = np.ones((output_dim, 1), np.float32)
        msk_np[0, 0] = 0.0
        msk = jnp.asarray(msk_np)
        in_specs += [
            pl.BlockSpec((output_dim, output_dim), lambda i: (0, 0)),   # TRIL constant
            pl.BlockSpec((output_dim, 1), lambda i: (0, 0)),            # softplus mask
        ]
        args += [tri, msk]
        kern = _mlp_head_kernel
        head_flops = 2 * rows_padded * output_dim * output_dim
        head_bytes = 4 * (output_dim * output_dim + output_dim)
        transcendentals = 2 * rows_padded * (output_dim - 1)
    else:
        kern = _mlp_kernel
        head_flops = 0
        head_bytes = 0
        transcendentals = 0

    grid = (rows_padded // tile,)
    cost = pl.CostEstimate(
        flops=2 * rows_padded * (input_dim * dim_ff + dim_ff * output_dim) + head_flops,
        transcendentals=transcendentals,
        bytes_accessed=4 * (rows_padded * (input_dim + output_dim)
                            + input_dim * dim_ff + dim_ff
                            + dim_ff * output_dim + output_dim) + head_bytes,
    )

    out_t = pl.pallas_call(
        kern,
        out_shape=jax.ShapeDtypeStruct((output_dim, rows_padded), jnp.float32),
        grid_spec=pltpu.PrefetchScalarGridSpec(
            num_scalar_prefetch=0,
            grid=grid,
            in_specs=in_specs,
            out_specs=pl.BlockSpec((output_dim, tile), lambda i: (0, i)),   # lane-dense out
        ),
        compiler_params=pltpu.CompilerParams(dimension_semantics=("parallel",)),
        cost_estimate=cost,
    )(*args)

    out = out_t.T[:rows]
    return out.reshape(B, nd, output_dim)


def _reference(x, params, *, num_diseases, output_dim):
    wb, bb, wo, bo = params
    B, nd, _ = x.shape
    h = jnp.maximum(x.reshape(B * nd, -1) @ wb + bb, 0.0)
    raw = (h @ wo + bo).reshape(-1, num_diseases, output_dim)
    if output_dim == 1:
        return raw
    h0 = raw[:, :, 0:1]
    gaps = jnp.log(1.0 + jnp.exp(raw[:, :, 1:]))   # exact PyTorch form
    cs = jnp.cumsum(gaps, axis=-1)
    return jnp.concatenate([h0, h0 + cs], axis=-1)


if __name__ == "__main__":
    key = jax.random.PRNGKey(0)
    B, num_diseases, input_dim = 4, 4, 16
    dim_feedforward, output_dim = 32, 5

    k1, k2, k3, k4, k5 = jax.random.split(key, 5)
    x = jax.random.normal(k1, (B, num_diseases, input_dim), jnp.float32)
    w_base = 0.1 * jax.random.normal(k2, (input_dim, dim_feedforward), jnp.float32)
    b_base = 0.1 * jax.random.normal(k3, (1, dim_feedforward), jnp.float32)
    w_out = 0.1 * jax.random.normal(k4, (dim_feedforward, output_dim), jnp.float32)
    b_out = 0.1 * jax.random.normal(k5, (1, output_dim), jnp.float32)
    params = (w_base, b_base, w_out, b_out)

    out = deep_quant_reg(x, params, num_diseases=num_diseases, output_dim=output_dim)
    jax.block_until_ready(out)
    ref = _reference(x, params, num_diseases=num_diseases, output_dim=output_dim)
    assert out.shape == (B, num_diseases, output_dim)
    assert jnp.allclose(out, ref, atol=1e-5, rtol=1e-5)

    # output_dim == 1 path (no quantile head).
    w_out1 = 0.1 * jax.random.normal(k4, (dim_feedforward, 1), jnp.float32)
    b_out1 = 0.1 * jax.random.normal(k5, (1, 1), jnp.float32)
    params1 = (w_base, b_base, w_out1, b_out1)
    out1 = deep_quant_reg(x, params1, num_diseases=num_diseases, output_dim=1)
    jax.block_until_ready(out1)
    ref1 = _reference(x, params1, num_diseases=num_diseases, output_dim=1)
    assert jnp.allclose(out1, ref1, atol=1e-5, rtol=1e-5)

    print("KERNEL_OK")
</pallas_src>

<mosaic_0001>
module attributes {stable_mosaic.version = 11 : i64} {
  func.func @_mlp_head_kernel(%arg0: i32, %arg1: memref<16x128xf32, #tpu.memory_space<vmem>>, %arg2: memref<32x16xf32, #tpu.memory_space<vmem>>, %arg3: memref<32x1xf32, #tpu.memory_space<vmem>>, %arg4: memref<5x32xf32, #tpu.memory_space<vmem>>, %arg5: memref<5x1xf32, #tpu.memory_space<vmem>>, %arg6: memref<5x5xf32, #tpu.memory_space<vmem>>, %arg7: memref<5x1xf32, #tpu.memory_space<vmem>>, %arg8: memref<5x128xf32, #tpu.memory_space<vmem>>) attributes {dimension_semantics = [#tpu.dimension_semantics<parallel>], iteration_bounds = array<i64: 1>, scalar_prefetch = 0 : i64, scratch_operands = 0 : i64, tpu.core_type = #tpu.core_type<tc>, window_params = [{transform_indices = @transform_0, window_bounds = array<i64: 16, 128>}, {pipeline_mode = #tpu.pipeline_mode<synchronous>, transform_indices = @transform_1, window_bounds = array<i64: 32, 16>}, {pipeline_mode = #tpu.pipeline_mode<synchronous>, transform_indices = @transform_2, window_bounds = array<i64: 32, 1>}, {pipeline_mode = #tpu.pipeline_mode<synchronous>, transform_indices = @transform_3, window_bounds = array<i64: 5, 32>}, {pipeline_mode = #tpu.pipeline_mode<synchronous>, transform_indices = @transform_4, window_bounds = array<i64: 5, 1>}, {pipeline_mode = #tpu.pipeline_mode<synchronous>, transform_indices = @transform_5, window_bounds = array<i64: 5, 5>}, {pipeline_mode = #tpu.pipeline_mode<synchronous>, transform_indices = @transform_6, window_bounds = array<i64: 5, 1>}, {transform_indices = @transform_7, window_bounds = array<i64: 5, 128>}]} {
    %c0 = arith.constant 0 : index
    %c0_0 = arith.constant 0 : index
    %0 = vector.load %arg2[%c0, %c0_0] : memref<32x16xf32, #tpu.memory_space<vmem>>, vector<32x16xf32>
    %c0_1 = arith.constant 0 : index
    %c0_2 = arith.constant 0 : index
    %1 = vector.load %arg1[%c0_1, %c0_2] : memref<16x128xf32, #tpu.memory_space<vmem>>, vector<16x128xf32>
    %cst = arith.constant dense<0.000000e+00> : vector<32x128xf32>
    %2 = tpu.matmul %0, %1, %cst {dimension_numbers = #tpu.dot_dimension_numbers<[1], [0], [0], [1], [0, 0, 1, 1], [], []>} : vector<32x16xf32>, vector<16x128xf32>, vector<32x128xf32> -> vector<32x128xf32>
    %c0_3 = arith.constant 0 : index
    %c0_4 = arith.constant 0 : index
    %3 = vector.load %arg3[%c0_3, %c0_4] : memref<32x1xf32, #tpu.memory_space<vmem>>, vector<32x1xf32>
    %4 = vector.broadcast %3 : vector<32x1xf32> to vector<32x128xf32>
    %5 = arith.addf %2, %4 : vector<32x128xf32>
    %cst_5 = arith.constant 0.000000e+00 : f32
    %6 = vector.broadcast %cst_5 : f32 to vector<32x128xf32>
    %7 = arith.maximumf %5, %6 : vector<32x128xf32>
    %c0_6 = arith.constant 0 : index
    %c0_7 = arith.constant 0 : index
    %8 = vector.load %arg4[%c0_6, %c0_7] : memref<5x32xf32, #tpu.memory_space<vmem>>, vector<5x32xf32>
    %cst_8 = arith.constant dense<0.000000e+00> : vector<5x128xf32>
    %9 = tpu.matmul %8, %7, %cst_8 {dimension_numbers = #tpu.dot_dimension_numbers<[1], [0], [0], [1], [0, 0, 1, 1], [], []>} : vector<5x32xf32>, vector<32x128xf32>, vector<5x128xf32> -> vector<5x128xf32>
    %c0_9 = arith.constant 0 : index
    %c0_10 = arith.constant 0 : index
    %10 = vector.load %arg5[%c0_9, %c0_10] : memref<5x1xf32, #tpu.memory_space<vmem>>, vector<5x1xf32>
    %11 = vector.broadcast %10 : vector<5x1xf32> to vector<5x128xf32>
    %12 = arith.addf %9, %11 : vector<5x128xf32>
    %cst_11 = arith.constant 2.000000e+01 : f32
    %13 = vector.broadcast %cst_11 : f32 to vector<5x128xf32>
    %14 = arith.cmpf ogt, %12, %13 : vector<5x128xf32>
    %cst_12 = arith.constant 2.000000e+01 : f32
    %15 = vector.broadcast %cst_12 : f32 to vector<5x128xf32>
    %16 = arith.minimumf %12, %15 : vector<5x128xf32>
    %17 = math.exp %16 : vector<5x128xf32>
    %cst_13 = arith.constant 1.000000e+00 : f32
    %18 = vector.broadcast %cst_13 : f32 to vector<5x128xf32>
    %19 = arith.addf %18, %17 : vector<5x128xf32>
    %20 = math.log %19 : vector<5x128xf32>
    %21 = arith.select %14, %12, %20 : vector<5x128xi1>, vector<5x128xf32>
    %c0_14 = arith.constant 0 : index
    %c0_15 = arith.constant 0 : index
    %22 = vector.load %arg7[%c0_14, %c0_15] : memref<5x1xf32, #tpu.memory_space<vmem>>, vector<5x1xf32>
    %cst_16 = arith.constant 0.000000e+00 : f32
    %23 = vector.broadcast %cst_16 : f32 to vector<5x1xf32>
    %24 = arith.cmpf ogt, %22, %23 : vector<5x1xf32>
    %25 = vector.shape_cast %24 : vector<5x1xi1> to vector<5x1xi1>
    %26 = vector.broadcast %25 : vector<5x1xi1> to vector<5x128xi1>
    %27 = arith.select %26, %21, %12 : vector<5x128xi1>, vector<5x128xf32>
    %c0_17 = arith.constant 0 : index
    %c0_18 = arith.constant 0 : index
    %28 = vector.load %arg6[%c0_17, %c0_18] : memref<5x5xf32, #tpu.memory_space<vmem>>, vector<5x5xf32>
    %cst_19 = arith.constant dense<0.000000e+00> : vector<5x128xf32>
    %29 = tpu.matmul %28, %27, %cst_19 {dimension_numbers = #tpu.dot_dimension_numbers<[1], [0], [0], [1], [0, 0, 1, 1], [], []>} : vector<5x5xf32>, vector<5x128xf32>, vector<5x128xf32> -> vector<5x128xf32>
    %c0_20 = arith.constant 0 : index
    %c0_21 = arith.constant 0 : index
    %30 = vector.load %arg8[%c0_20, %c0_21] : memref<5x128xf32, #tpu.memory_space<vmem>>, vector<5x128xf32>
    tpu.vector_store %arg8[%c0_20, %c0_21], %29 {strides = array<i32>} : memref<5x128xf32, #tpu.memory_space<vmem>>, vector<5x128xf32>,
    return
  }
  func.func @transform_0(%arg0: i32) -> (i32, i32) {
    %c0_i32 = arith.constant 0 : i32
    %c0_i32_0 = arith.constant 0 : i32
    return %c0_i32, %arg0 : i32, i32
  }
  func.func @transform_1(%arg0: i32) -> (i32, i32) {
    %c0_i32 = arith.constant 0 : i32
    %c0_i32_0 = arith.constant 0 : i32
    %c0_i32_1 = arith.constant 0 : i32
    return %c0_i32, %c0_i32_0 : i32, i32
  }
  func.func @transform_2(%arg0: i32) -> (i32, i32) {
    %c0_i32 = arith.constant 0 : i32
    %c0_i32_0 = arith.constant 0 : i32
    %c0_i32_1 = arith.constant 0 : i32
    return %c0_i32, %c0_i32_0 : i32, i32
  }
  func.func @transform_3(%arg0: i32) -> (i32, i32) {
    %c0_i32 = arith.constant 0 : i32
    %c0_i32_0 = arith.constant 0 : i32
    %c0_i32_1 = arith.constant 0 : i32
    return %c0_i32, %c0_i32_0 : i32, i32
  }
  func.func @transform_4(%arg0: i32) -> (i32, i32) {
    %c0_i32 = arith.constant 0 : i32
    %c0_i32_0 = arith.constant 0 : i32
    %c0_i32_1 = arith.constant 0 : i32
    return %c0_i32, %c0_i32_0 : i32, i32
  }
  func.func @transform_5(%arg0: i32) -> (i32, i32) {
    %c0_i32 = arith.constant 0 : i32
    %c0_i32_0 = arith.constant 0 : i32
    %c0_i32_1 = arith.constant 0 : i32
    return %c0_i32, %c0_i32_0 : i32, i32
  }
  func.func @transform_6(%arg0: i32) -> (i32, i32) {
    %c0_i32 = arith.constant 0 : i32
    %c0_i32_0 = arith.constant 0 : i32
    %c0_i32_1 = arith.constant 0 : i32
    return %c0_i32, %c0_i32_0 : i32, i32
  }
  func.func @transform_7(%arg0: i32) -> (i32, i32) {
    %c0_i32 = arith.constant 0 : i32
    %c0_i32_0 = arith.constant 0 : i32
    return %c0_i32, %arg0 : i32, i32
  }
}

</mosaic_0001>

<bundles_post_ra>
// kernel: tpu_custom_call.1
= control target key start
LH: loop header
LB: loop body
LE: loop exit
PB: predicated region body
PF: predicated region fallthrough
CT: control target
= control target key end

     0   :  { %vm57_vm0 = vcmask 130048   ;;  %v441_v4 = vmov 0   ;;  %s544_s0 = inlined_call_operand.vmem [shape: f32[16,128], index: 0, kind: input, shape index: {}]   ;;  %s545_s1 = inlined_call_operand.vmem [shape: f32[32,16], index: 1, kind: input, shape index: {}]   ;;  %s546_s2 = inlined_call_operand.vmem [shape: f32[32,1], index: 2, kind: input, shape index: {}]   ;;  %s547_s3 = inlined_call_operand.vmem [shape: f32[5,32], index: 3, kind: input, shape index: {}]   ;;  %s548_s4 = inlined_call_operand.vmem [shape: f32[5,1], index: 4, kind: input, shape index: {}]   ;;  %s549_s5 = inlined_call_operand.vmem [shape: f32[5,5], index: 5, kind: input, shape index: {}]   ;;  %s550_s6 = inlined_call_operand.vmem [shape: f32[5,1], index: 6, kind: input, shape index: {}]   ;;  %s551_s7 = inlined_call_operand.hbm [shape: f32[5,128], index: 7, kind: output, shape index: {}]  }
   0x1   :  { %v31_v0 = vld [vmem:[%s544_s0] sm:$0xff]  ;;  %v32_v1 = vld [vmem:[%s544_s0 + $0x8] sm:$0xff]  ;;  %411 = vset.pattern.permute.xlu0 %v441_v4  ;;  %412 = vset.pattern.permute.xlu1 %v441_v4  ;;  %v35_v6 = vld [vmem:[%s546_s2 + $0x10] sm:$0xff] }
   0x2   :  { %v27_v2 = vld [vmem:[%s545_s1] sm:$0xff]  ;;  %v396_v3 = vpack.c.bf16 %v32_v1, %v31_v0  ;;  %v28_v8 = vld [vmem:[%s545_s1 + $0x8] sm:$0xff]  ;;  %49 = vperm.xlu1 %412, %v35_v6  }
   0x3   :  { %374 = vmatprep.mubr.msk.f32.mxu0 %vm57_vm0, %v27_v2  ;;  %v33_v5 = vld [vmem:[%s546_s2] sm:$0xff]  ;;  %v34_v9 = vld [vmem:[%s546_s2 + $0x8] sm:$0xff] }
   0x4   :  { %397 = vmatprep.subr.bf16.mxu0 %v396_v3  ;;  %39 = vperm.xlu0 %411, %v33_v5   ;;  %v248_v7 = vld [vmem:[%s550_s6] sm:$0x1f] }
   0x5   :  { %399 = vmatpush3.bf16.msra.mxu0 %v396_v3 }
   0x6   :  { %12 = vsyncpa [#allocation3], 0  ;;  %v29_v10 = vld [vmem:[%s545_s1 + $0x10] sm:$0xff]  ;;  %v36_v11 = vld [vmem:[%s546_s2 + $0x18] sm:$0xff]  ;;  %vm249_vm1 = vcmp.gt.f32.partialorder %v248_v7, 0.0  ;;  %v442_v15 = vmov 0.0|0.0  }
   0x7   :  { %v30_v12 = vld [vmem:[%s545_s1 + $0x18] sm:$0xff]  ;;  %54 = vperm.xlu1 %412, %v36_v11   ;;  %v160_v13 = vld [vmem:[%s548_s4] sm:$0x1f]  ;;  %v250_v14 = vsel %vm249_vm1, 1, %v441_v4  ;;  %400 = vmatprep.subr.bf16.mxu1 %v442_v15  ;;  %vm443_vm2 = vmmov 0   ;;  %v444_v16 = vmov 0.0  }
   0x8   :  { %375 = vmatmul.mubr.msk.f32.vlgmr.msra.gmra.mrb[0].mxu0 %vm57_vm0, %v28_v8  ;;  %44 = vperm.xlu0 %411, %v34_v9   ;;  %v159_v35 = vld [vmem:[%s547_s3] sm:$0x1f]  ;;  %vm166_vm3 = vcmask 261120   ;;  %vm261_vm5 = vcmask 1044480   ;;  %vm257_vm7 = vcmask 39936   ;;  %s445_s23 = smov [#allocation2]  }
   0x9   :  { %377 = vmatprep.mubr.msk.f32.mxu0 %vm57_vm0, %v29_v10  ;;  %388 = vmatprep.mubr.msk.f32.mxu1 %vm443_vm2, %v444_v16  ;;  %v256_v48 = vld [vmem:[%s549_s5] sm:$0x1f]  ;;  %s342_s24 = sshll.u32 %s445_s23, 4  ;;  %s343_s24 = int_to_ptr.vmem [resolvable:$true] %s342_s24 }
   0xa   :  { %391 = vmatprep.subr.mxu0 %v444_v16  ;;  %s417_s25 = scalar_lea.vmem %s343_s24, 128  ;;  %p422_p1 = scmp.lt.s32.totalorder %s343_s24, %s343_s24 }
   0xb   :  { %252 = vperm.xlu1 %412, %v250_v14   ;;  %p418_p0 = scmp.ne.s32.totalorder %s343_s24, %s417_s25  ;;  %p423_p2 = scmp.lt.s32.totalorder %s417_s25, %s417_s25 }
   0xc   :  { %378 = vmatmul.mubr.msk.f32.gmra.mrb[2].mxu0 %vm57_vm0, %v30_v12  ;;  %163 = vperm.xlu0 %411, %v160_v13  }
   0xd   :  { %393 = vmatprep.mubr.msk.f32.mxu0 %vm443_vm2, %v444_v16  ;;  %p424_p3 = por %p423_p2, %p422_p1 }
   0xf   :  { %p425_p4 = pnand %p424_p3, %p418_p0 }
  0x81   :  { %v50_v18 = vpop.permute.xlu1 %49 }
  0x83   :  { %v40_v17 = vpop.permute.xlu0 %39 }
  0x86   :  { %v55_v25 = vpop.permute.xlu1 %54 }
  0x87   :  { %v45_v19 = vpop.permute.xlu0 %44 }
  0x8a   :  { %v253_v45 = vpop.permute.xlu1 %252 }
  0x8b   :  { %v164_v36 = vpop.permute.xlu0 %163  ;;  %vm254_vm6 = vcmp.eq.s32.totalorder %v253_v45, 1 }
  0xdb   :  { %v376_v20 = vpop.f32.mrb[0].mxu0 }
  0xdc   :  { %v142_v21 = vadd.f32 %v376_v20, %v45_v19  ;;  %v136_v22 = vpop.f32.mrb[1].mxu0 }
  0xdd   :  { %v137_v23 = vadd.f32 %v136_v22, %v40_v17 }
  0xde   :  { %v156_v24 = vmax.f32 %v142_v21, 0.0 }
  0xdf   :  { %v155_v26 = vmax.f32 %v137_v23, 0.0  ;;  %v379_v27 = vpop.f32.mrb[2].mxu0 }
  0xe0   :  { %v152_v28 = vadd.f32 %v379_v27, %v55_v25  ;;  %v146_v29 = vpop.f32.mrb[3].mxu0 }
  0xe1   :  { %v147_v30 = vadd.f32 %v146_v29, %v50_v18  ;;  %v401_v31 = vpack.c.bf16 %v156_v24, %v155_v26 }
  0xe2   :  { %v158_v32 = vmax.f32 %v152_v28, 0.0 }
  0xe3   :  { %v157_v33 = vmax.f32 %v147_v30, 0.0  ;;  %402 = vmatpush3.bf16.msra.mxu1 %v401_v31 }
  0xe4   :  { %403 = vmatprep.subr.bf16.mxu1 %v442_v15 }
  0xe5   :  { %v404_v34 = vpack.c.bf16 %v158_v32, %v157_v33 }
  0xe7   :  { %405 = vmatpush3.bf16.msra.mxu1 %v404_v34 }
  0xea   :  { %389 = vmatmul.mubr.msk.f32.vlgmr.msra.gmra.mrb[0].mxu1 %vm166_vm3, %v159_v35 }
 0x1bd   :  { %v236_v37 = vpop.f32.mrb[0].mxu1 }
 0x1be   :  { %v237_v38 = vadd.f32 %v236_v37, %v164_v36  ;;  %v390_v39 = vpop.f32.mrb[1].mxu1 }
 0x1c0   :  { %v241_v40 = vmin.f32 %v237_v38, 20.0  ;;  %vm240_vm4 = vcmp.gt.f32.partialorder %v237_v38, 20.0 }
 0x1c2   :  { %v242_v41 = vmul.f32 1.442695, %v241_v40 }
 0x1c4   :  { %413 = vpow2.f32 %v242_v41 }
 0x1ce   :  { %v414_v42 = vpop.eup %413 }
 0x1cf   :  { %v244_v43 = vadd.f32 1.0, %v414_v42 }
 0x1d1   :  { %415 = vlog2.f32 %v244_v43 }
 0x1db   :  { %v416_v44 = vpop.eup %415 }
 0x1dc   :  { %v246_v46 = vmul.f32 0.6931472, %v416_v44 }
 0x1de   :  { %v247_v47 = vsel %vm240_vm4, %v237_v38, %v246_v46 }
 0x1df   :  { %v255_v49 = vsel %vm254_vm6, %v247_v47, %v237_v38 }
 0x1e0   :  { %392 = vmatpush3.msk.msra.mxu0 %vm261_vm5, %v255_v49 }
 0x1e1   :  { %394 = vmatmul.mubr.msk.f32.vlgmr.msra.gmra.mrb[4].mxu0 %vm257_vm7, %v256_v48 }
 0x2b4   :  { %v331_v50 = vpop.f32.mrb[4].mxu0 }
 0x2b5   :  { %335 = vst [vmem:[#allocation2] sm:$0x1f] %v331_v50  ;;  %v395_v51 = vpop.f32.mrb[5].mxu0 }
 0x2b6   :  { %428 = shalt.err (!%p425_p4)
}
 0x2b7   :  { %s429_s5 = scalar_lea.hbm %s551_s7, 128 }
 0x2b8   :  { %p430_p5 = scmp.ne.s32.totalorder %s551_s7, %s429_s5  ;;  %p433_p6 = scmp.lt.u32.totalorder %s429_s5, %s551_s7 }
 0x2ba   :  { %p435_p7 = pnand %p433_p6, %p430_p5 }
 0x2bc   :  { %438 = shalt.err (!%p435_p7)
}
 0x2bd   :  { %345 = dma.vmem_to_hbm [thread:$0]  %s343_s24, 128, %s551_s7, [#allocation3]  }
 0x2be   :  { %439 = dma.done.wait [#allocation3], 128  }
 0x2bf   :  { %440 = vsyncadd [#allocation3], 4294967168 }
 0x2c0   :  { %349 = vsyncpa [#allocation3], 1 }

</bundles_post_ra>
